<compile_context>
chip_gen: v5e
topology: v5e:2x2
jax: 0.10.0
libtpu: 0.0.40
codegen_flags: <defaults>
</compile_context>

<pallas_src>
import jax
import jax.numpy as jnp
from jax.experimental import pallas as pl
from jax.experimental.pallas import tpu as pltpu


def combined_kernel(x_ref, packed_ref, b2sum_ref, o_ref):
    batch, d_in = x_ref.shape
    # Static slices of the single packed constant ref.
    w1 = packed_ref[:d_in, :]                 # (d_in, Hp)  fused [w1a | w1b], zero-padded
    b1 = packed_ref[d_in:d_in + 1, :]         # (1, Hp)     fused [b1a | b1b], zero-padded
    w2s = packed_ref[d_in + 1:d_in + 2, :]    # (1, Hp)     rowsum(w2a) | rowsum(w2b), padded

    # One fused MXU matmul: (B, d_in) @ (d_in, Hp) -> (B, Hp), f32 accumulate.
    h = jnp.dot(x_ref[...], w1, preferred_element_type=jnp.float32)
    h = jnp.maximum(h + b1, 0.0)              # plain VPU add + ReLU (lane-dense)
    s = jnp.sum(h * w2s)                      # folded output layer: scale + reduce
    # Add batch * (sum(b2a) + sum(b2b)); single scalar SMEM store.
    o_ref[0, 0] = s + b2sum_ref[0, 0] * batch


def make_combined_nn(params_nn1, params_nn2):
    """params_nnX = (w1, b1, w2, b2) with w's stored as (in, out).

    Returns a jitted forward(x) with all constant prep done once here.
    """
    w1a, b1a, w2a, b2a = params_nn1
    w1b, b1b, w2b, b2b = params_nn2
    d_in = w1a.shape[0]
    h2 = w1a.shape[1] + w1b.shape[1]
    hp = max(128, pl.cdiv(h2, 128) * 128)     # lane-dense padded hidden dim

    # --- one-time algebraic prep (not on the per-call path) ---
    w1cat = jnp.concatenate([w1a, w1b], axis=1)                              # (d_in, 2H)
    b1cat = jnp.concatenate([b1a, b1b])[None, :]                             # (1, 2H)
    w2sum = jnp.concatenate([jnp.sum(w2a, axis=1), jnp.sum(w2b, axis=1)])[None, :]  # (1, 2H)
    packed = jnp.concatenate([w1cat, b1cat, w2sum], axis=0).astype(jnp.float32)
    packed = jnp.pad(packed, ((0, 0), (0, hp - h2)))                         # (d_in+2, Hp)
    b2sum = (jnp.sum(b2a) + jnp.sum(b2b)).reshape(1, 1).astype(jnp.float32)  # (1, 1)

    packed = jax.device_put(packed)
    b2sum = jax.device_put(b2sum)

    @jax.jit
    def forward(x):
        out = pl.pallas_call(
            combined_kernel,
            out_shape=jax.ShapeDtypeStruct((1, 1), jnp.float32),
            in_specs=[
                pl.BlockSpec(memory_space=pltpu.MemorySpace.VMEM),   # x (full block)
                pl.BlockSpec(memory_space=pltpu.MemorySpace.VMEM),   # packed constants
                pl.BlockSpec(memory_space=pltpu.MemorySpace.SMEM),   # b2 sum scalar
            ],
            out_specs=pl.BlockSpec(memory_space=pltpu.MemorySpace.SMEM),
        )(x.astype(jnp.float32), packed, b2sum)
        return out[0, 0]

    return forward


def _reference(x, p1, p2):
    def mlp(x, w1, b1, w2, b2):
        h = jnp.maximum(x @ w1 + b1, 0.0)
        return h @ w2 + b2
    return jnp.sum(mlp(x, *p1)) + jnp.sum(mlp(x, *p2))


if __name__ == "__main__":
    batch, d_in, d_hidden, d_out = 8, 32, 32, 16

    key = jax.random.PRNGKey(0)
    ks = jax.random.split(key, 9)

    x = jax.random.normal(ks[0], (batch, d_in), dtype=jnp.float32)

    # nn1: Linear(d_in, d_hidden) -> ReLU -> Linear(d_hidden, d_out)
    p1 = (
        jax.random.normal(ks[1], (d_in, d_hidden), jnp.float32) * 0.1,
        jax.random.normal(ks[2], (d_hidden,), jnp.float32) * 0.1,
        jax.random.normal(ks[3], (d_hidden, d_out), jnp.float32) * 0.1,
        jax.random.normal(ks[4], (d_out,), jnp.float32) * 0.1,
    )
    # nn2: independent weights, same architecture
    p2 = (
        jax.random.normal(ks[5], (d_in, d_hidden), jnp.float32) * 0.1,
        jax.random.normal(ks[6], (d_hidden,), jnp.float32) * 0.1,
        jax.random.normal(ks[7], (d_hidden, d_out), jnp.float32) * 0.1,
        jax.random.normal(ks[8], (d_out,), jnp.float32) * 0.1,
    )

    combined_nn = make_combined_nn(p1, p2)   # one-time prep + jit
    out = combined_nn(x)
    out = jax.block_until_ready(out)

    ref = _reference(x, p1, p2)
    assert jnp.allclose(out, ref, rtol=1e-5, atol=1e-4), (out, ref)

    print("KERNEL_OK")
</pallas_src>

<mosaic_0001>
module attributes {stable_mosaic.version = 11 : i64} {
  func.func @combined_kernel(%arg0: memref<8x32xf32, #tpu.memory_space<vmem>>, %arg1: memref<34x128xf32, #tpu.memory_space<vmem>>, %arg2: memref<1x1xf32, #tpu.memory_space<smem>>, %arg3: memref<1x1xf32, #tpu.memory_space<smem>>) attributes {dimension_semantics = [], scalar_prefetch = 0 : i64, scratch_operands = 0 : i64, tpu.core_type = #tpu.core_type<tc>} {
    %c0 = arith.constant 0 : index
    %c0_0 = arith.constant 0 : index
    %0 = vector.load %arg1[%c0, %c0_0] : memref<34x128xf32, #tpu.memory_space<vmem>>, vector<32x128xf32>
    %c32 = arith.constant 32 : index
    %c0_1 = arith.constant 0 : index
    %1 = vector.load %arg1[%c32, %c0_1] : memref<34x128xf32, #tpu.memory_space<vmem>>, vector<1x128xf32>
    %c33 = arith.constant 33 : index
    %c0_2 = arith.constant 0 : index
    %2 = vector.load %arg1[%c33, %c0_2] : memref<34x128xf32, #tpu.memory_space<vmem>>, vector<1x128xf32>
    %c0_3 = arith.constant 0 : index
    %c0_4 = arith.constant 0 : index
    %3 = vector.load %arg0[%c0_3, %c0_4] : memref<8x32xf32, #tpu.memory_space<vmem>>, vector<8x32xf32>
    %cst = arith.constant dense<0.000000e+00> : vector<8x128xf32>
    %4 = tpu.matmul %3, %0, %cst {dimension_numbers = #tpu.dot_dimension_numbers<[1], [0], [0], [1], [0, 0, 1, 1], [], []>} : vector<8x32xf32>, vector<32x128xf32>, vector<8x128xf32> -> vector<8x128xf32>
    %5 = vector.broadcast %1 : vector<1x128xf32> to vector<8x128xf32>
    %6 = arith.addf %4, %5 : vector<8x128xf32>
    %cst_5 = arith.constant 0.000000e+00 : f32
    %7 = vector.broadcast %cst_5 : f32 to vector<8x128xf32>
    %8 = arith.maximumf %6, %7 : vector<8x128xf32>
    %9 = vector.broadcast %2 : vector<1x128xf32> to vector<8x128xf32>
    %10 = arith.mulf %8, %9 : vector<8x128xf32>
    %11 = vector.shape_cast %10 : vector<8x128xf32> to vector<1x8x128xf32>
    %cst_6 = arith.constant dense<0.000000e+00> : vector<1xf32>
    %12 = vector.multi_reduction <add>, %11, %cst_6 [1, 2] : vector<1x8x128xf32> to vector<1xf32>
    %13 = vector.shape_cast %12 : vector<1xf32> to vector<1x1x1xf32>
    %14 = vector.extract %13[0, 0, 0] : f32 from vector<1x1x1xf32>
    %c0_7 = arith.constant 0 : index
    %c0_8 = arith.constant 0 : index
    %15 = memref.load %arg2[%c0_7, %c0_8] : memref<1x1xf32, #tpu.memory_space<smem>>
    %cst_9 = arith.constant 8.000000e+00 : f32
    %16 = arith.mulf %15, %cst_9 : f32
    %17 = arith.addf %14, %16 : f32
    %c0_10 = arith.constant 0 : index
    %c0_11 = arith.constant 0 : index
    %18 = memref.load %arg3[%c0_10, %c0_11] : memref<1x1xf32, #tpu.memory_space<smem>>
    memref.store %17, %arg3[%c0_10, %c0_11] : memref<1x1xf32, #tpu.memory_space<smem>>
    return
  }
}

</mosaic_0001>

<bundles_post_ra>
// kernel: forward.1
= control target key start
LH: loop header
LB: loop body
LE: loop exit
PB: predicated region body
PF: predicated region fallthrough
CT: control target
= control target key end

     0   :  { %9 = vsyncpa [#allocation4], 0  ;;  %s225_s0 = inlined_call_operand.hbm [shape: f32[8,32], index: 0, kind: input, shape index: {}]   ;;  %s226_s1 = inlined_call_operand.hbm [shape: f32[34,128], index: 1, kind: input, shape index: {}]   ;;  %s227_s2 = inlined_call_operand.<no memory space> [shape: f32[1,1], index: 2, kind: input, shape index: {}]   ;;  %s228_s3 = inlined_call_operand.hbm [shape: f32[1,1], index: 3, kind: output, shape index: {}]  }
   0x1   :  { %10 = vsyncpa [#allocation7], 0 }
   0x2   :  { %11 = vsyncpa [#allocation5], 0  ;;  %s17_s14 = sshll.u32 %s225_s0, 4  ;;  %s188_s15 = smov [#allocation3]   ;;  %s18_s14 = int_to_ptr.hbm [resolvable:$true] %s17_s14 }
   0x3   :  { %s19_s16 = sshll.u32 %s188_s15, 4  ;;  %s27_s19 = sshll.u32 %s226_s1, 4  ;;  %s20_s16 = int_to_ptr.vmem [resolvable:$true] %s19_s16  ;;  %s28_s19 = int_to_ptr.hbm [resolvable:$true] %s27_s19 }
   0x4   :  { %22 = dma.hbm_to_vmem [thread:$0]  %s18_s14, 128, %s20_s16, [#allocation4]  }
   0x5   :  { %s189_s20 = smov [#allocation6]   ;;  %s190_s22 = smov 128  }
   0x6   :  { %s29_s21 = sshll.u32 %s189_s20, 4  ;;  %s191_s23 = smov 8   ;;  %s30_s21 = int_to_ptr.vmem [resolvable:$true] %s29_s21 }
   0x7   :  { %35 = dma.hbm_to_vmem [thread:$0]  %s28_s19, 640, %s30_s21, [#allocation7], %s190_s22, %s190_s22, %s191_s23  }
   0x8   :  { %182 = dma.done.wait [#allocation4], 128  }
   0x9   :  { %183 = vsyncadd [#allocation4], 4294967168 }
   0xa   :  { %184 = dma.done.wait [#allocation7], 640  }
   0xb   :  { %185 = vsyncadd [#allocation7], 4294966656  ;;  %v49_v0 = vld [vmem:[#allocation6 + $0x18] sm:$0xff]  ;;  %v48_v1 = vld [vmem:[#allocation6 + $0x10] sm:$0xff]  ;;  %vm54_vm0 = vcmask 261120   ;;  %s91_s24 = smul.f32 8.0, %s227_s2 }
   0xc   :  { %70 = vmatpush.msra.mxu0 %v49_v0  ;;  %v47_v2 = vld [vmem:[#allocation6 + $0x8] sm:$0xff]  ;;  %v46_v3 = vld [vmem:[#allocation6] sm:$0xff]  ;;  %v52_v4 = vld [vmem:[#allocation3] sm:$0xff]  ;;  %s100_s27 = sshll.u32 %s228_s3, 4  ;;  %s192_s30 = smov [#allocation8]   ;;  %s101_s27 = int_to_ptr.hbm [resolvable:$true] %s100_s27 }
   0xd   :  { %v120_v5 = vld [vmem:[#allocation6 + $0x20] ss:$0 sm:$0xff]  ;;  %v121_v8 = vld [vmem:[#allocation6 + $0x21] ss:$0 sm:$0xff] }
   0xe   :  { %71 = vmatpush.msra.mxu0 %v48_v1 }
  0x10   :  { %72 = vmatpush.msra.mxu0 %v47_v2 }
  0x12   :  { %73 = vmatpush.msra.mxu0 %v46_v3 }
  0x13   :  { %112 = vmatmul.msk.f32.vlgmr.msra.gmra.mxu0 %vm54_vm0, %v52_v4 }
  0x90   :  { %v75_v6 = vpop.f32.mrf.mxu0 }
  0x91   :  { %v76_v7 = vadd.f32 %v120_v5, %v75_v6 }
  0x93   :  { %v78_v9 = vmax.f32 %v76_v7, 0.0 }
  0x95   :  { %v80_v10 = vmul.f32 %v121_v8, %v78_v9 }
  0x97   :  { %81 = vadd.xlane.f32.xlu0 %v80_v10 }
 0x10a   :  { %v82_v11 = vpop.xlane.xlu0 %81 }
 0x10b   :  { %v83_v12 = vrot.slane %v82_v11, 4 }
 0x10d   :  { %v84_v13 = vadd.f32 %v83_v12, %v82_v11 }
 0x10f   :  { %v85_v14 = vrot.slane %v84_v13, 2 }
 0x111   :  { %v86_v15 = vadd.f32 %v85_v14, %v84_v13 }
 0x113   :  { %v87_v16 = vrot.slane %v86_v15, 1 }
 0x115   :  { %v88_v17 = vadd.f32 %v87_v16, %v86_v15 }
 0x117   :  { %113 = vpush %v88_v17 }
 0x148   :  { %s114_s28 = spop %113 }
 0x149   :  { %s92_s29 = sadd.f32 %s114_s28, %s91_s24 }
 0x14b   :  { %94 = sst [smem:[#allocation8]] %s92_s29 }
 0x14c   :  { %103 = dma.smem_to_hbm %s192_s30, 16, %s101_s27, [#allocation5]  }
 0x14d   :  { %186 = dma.done.wait [#allocation5], 16  }
 0x14e   :  { %187 = vsyncadd [#allocation5], 4294967280 }
 0x14f   :  { %108 = sfence }
 0x150   :  { %109 = vsyncpa [#allocation4], 1 }
 0x151   :  { %110 = vsyncpa [#allocation7], 1 }
 0x152   :  { %111 = vsyncpa [#allocation5], 1 }

</bundles_post_ra>
